<compile_context>
chip_gen: v6e
topology: v6e:2x2x1
jax: 0.10.0
libtpu: 0.0.40
codegen_flags: <defaults>
</compile_context>

<pallas_src>
import functools
import numpy as np
import jax
import jax.numpy as jnp
from jax.experimental import pallas as pl
from jax.experimental.pallas import tpu as pltpu

_TARGET_BLOCK_BYTES = 4 << 20     # ~4 MiB per input block (review item 1)
_VMEM_CAP_BYTES = 48 << 20        # safe ceiling on v7x (64 MiB phys); ample on v5e/v6e
_TINY_M = 512                     # below this lane extent, XLA beats a kernel launch
_MIN_PARALLEL_STEPS = 4           # >= 2 per TensorCore on dual-core v7x


def _cdiv(a, b):
    return -(-a // b)


def _round_up(a, b):
    return _cdiv(a, b) * b


def _pick_tile_m(c, m, b, itemsize):
    """Choose the lane-tile (positions-per-block) size.

    - targets ~_TARGET_BLOCK_BYTES per input block,
    - accounts for real dtype itemsize and sublane packing (8/16/32),
    - guarantees >= _MIN_PARALLEL_STEPS grid steps when M allows (v7x megacore),
    - shrinks the tile if the double-buffered VMEM estimate would exceed the
      conservative 48 MiB cap (v7x guard).
    Returns (tile_m, vmem_limit_bytes).
    """
    pack = 8 * max(1, 4 // max(1, itemsize))          # f32->8, bf16->16, int8->32
    c_pad = _round_up(c, pack)                        # sublane padding in VMEM

    # Target-sized lane tile (multiple of 128, or the whole M if it fits).
    t = (_TARGET_BLOCK_BYTES // (c_pad * itemsize)) // 128 * 128
    t = max(t, 128)
    tile_m = m if m <= t else t

    # Guarantee enough parallel grid steps to feed both v7x TensorCores.
    steps = b * _cdiv(m, tile_m)
    if steps < _MIN_PARALLEL_STEPS and m > 128:
        want = _cdiv(_MIN_PARALLEL_STEPS, b)          # splits needed along M
        cap = max(128, _round_up(_cdiv(m, want), 128))
        tile_m = min(tile_m, cap)

    # VMEM budget guard: 2x double-buffered (in + out) + ~3 f32 working copies
    # of the tile inside the kernel body + slack.  Shrink (in 128-lane steps,
    # keeping the (8,128) divisibility) if it would blow past the v7x-safe cap.
    def _need(tm):
        blk = c_pad * itemsize * tm
        f32_blk = c_pad * 4 * tm
        return 4 * blk + 3 * f32_blk + (2 << 20)

    while _need(tile_m) > _VMEM_CAP_BYTES and tile_m > 128:
        tile_m = max(128, ((tile_m - 1) // 128) * 128)

    vmem_limit = int(min(_VMEM_CAP_BYTES, max(32 << 20, _need(tile_m))))
    return tile_m, vmem_limit


# ----------------------------- Pallas kernel ------------------------------ #
def _channel_ln_kernel(x_ref, g_ref, b_ref, o_ref, *, eps, c):
    # Block layout: (C, TILE_M) -- channels on sublanes, positions on lanes.
    # Channel reduction goes over the sublane axis; stores are lane-dense.
    #
    # NOTE on ragged last tile: padded/out-of-bounds lane columns are computed
    # on whatever is in the buffer (can be inf/NaN there) and masked on
    # writeback.  Harmless because nothing ever crosses lane columns -- do NOT
    # "fix" this with a cross-lane op.
    x = x_ref[...].astype(jnp.float32)                     # (C, TM)
    mean = jnp.sum(x, axis=0, keepdims=True) * (1.0 / c)   # (1, TM)
    d = x - mean
    # Two-pass variance: numerically robust (no s2 - s1*mean cancellation) and
    # free here -- the tile is already resident in VMEM.
    # torch.std default is unbiased (divide by C-1).  Guarded for C == 1
    # (torch would produce NaN there; we emit a 0-centered output instead).
    var = jnp.sum(d * d, axis=0, keepdims=True) * (1.0 / max(c - 1, 1))
    std = jnp.sqrt(var)
    # One reciprocal per position, then a broadcast multiply (not a full-tile
    # divide).  Semantics are (x-mean)/(std+eps), NOT rsqrt(var+eps).
    inv = pl.reciprocal(std + eps, approx=False)           # (1, TM)
    o_ref[...] = (d * inv * g_ref[...] + b_ref[...]).astype(o_ref.dtype)


def _channel_ln_jnp(x, gamma, beta, eps):
    """Plain-XLA fallback for tiny tensors (same semantics as the kernel)."""
    c = x.shape[1]
    xf = x.astype(jnp.float32)
    mean = jnp.mean(xf, axis=1, keepdims=True)
    d = xf - mean
    var = jnp.sum(d * d, axis=1, keepdims=True) / max(c - 1, 1)
    std = jnp.sqrt(var)
    gshape = (1, c) + (1,) * (x.ndim - 2)
    g = jnp.asarray(gamma, jnp.float32).reshape(gshape)
    b = jnp.asarray(beta, jnp.float32).reshape(gshape)
    return (d / (std + eps) * g + b).astype(x.dtype)


def channel_layer_norm(x, gamma, beta, eps=1e-5):
    """x: (b, c, ...) channels-first, like PyTorch ChannelLayerNorm input.

    Normalizes over axis 1 per (batch, position).  Only free contiguous
    reshapes happen outside the kernel -- no transpose, no pad.  Tensors whose
    flattened position extent is tiny are routed to plain jnp (launch +
    masked-store overhead would dominate a pallas_call there).
    """
    b, c = int(x.shape[0]), int(x.shape[1])
    trailing = x.shape[2:]
    m = int(np.prod(trailing)) if len(trailing) else 1

    if m < _TINY_M:
        # Review item 5: bias tensors / tiny weights -> XLA, not a kernel launch.
        return _channel_ln_jnp(x, gamma, beta, eps)

    x3 = x.reshape(b, c, m)                                 # contiguous: free
    g2 = jnp.asarray(gamma, jnp.float32).reshape(c, 1)
    b2 = jnp.asarray(beta, jnp.float32).reshape(c, 1)

    itemsize = jnp.dtype(x.dtype).itemsize
    tile_m, vmem_limit = _pick_tile_m(c, m, b, itemsize)
    grid = (b, pl.cdiv(m, tile_m))

    out = pl.pallas_call(
        functools.partial(_channel_ln_kernel, eps=eps, c=c),
        out_shape=jax.ShapeDtypeStruct((b, c, m), x.dtype),
        grid_spec=pltpu.PrefetchScalarGridSpec(
            num_scalar_prefetch=0,
            grid=grid,
            in_specs=[
                # batch dim squeezed out of the kernel ref -> (C, TILE_M)
                pl.BlockSpec((None, c, tile_m), lambda i, j: (i, 0, j)),
                pl.BlockSpec((c, 1), lambda i, j: (0, 0)),
                pl.BlockSpec((c, 1), lambda i, j: (0, 0)),
            ],
            out_specs=pl.BlockSpec((None, c, tile_m), lambda i, j: (i, 0, j)),
        ),
        compiler_params=pltpu.CompilerParams(
            dimension_semantics=("parallel", "parallel"),
            vmem_limit_bytes=vmem_limit,
        ),
    )(x3, g2, b2)
    return out.reshape(x.shape)


# --------------------- WeightSpaceFeatures glue (plain JAX) ---------------- #
def shape_wsfeat_symmetry(weights, biases, spec_shapes):
    # conv weight feature:  b c o i h w -> b (c h w) o i ; mlp unchanged
    new_w = []
    for w, shp in zip(weights, spec_shapes):
        if len(shp) == 2:
            new_w.append(w)
        else:
            b, c, o, i, h, wd = w.shape
            new_w.append(jnp.transpose(w, (0, 1, 4, 5, 2, 3)).reshape(b, c * h * wd, o, i))
    return new_w, list(biases)


def unshape_wsfeat_symmetry(weights, biases, spec_shapes):
    # b (c h w) o i -> b c o i h w ; mlp unchanged
    new_w = []
    for w, shp in zip(weights, spec_shapes):
        if len(shp) == 2:
            new_w.append(w)
        else:
            h, wd = shp[2], shp[3]
            b, chw, o, i = w.shape
            c = chw // (h * wd)
            new_w.append(jnp.transpose(w.reshape(b, c, h, wd, o, i), (0, 1, 4, 5, 2, 3)))
    return new_w, list(biases)


class SimpleLayerNormPallas:
    def __init__(self, spec_shapes, channels, eps=1e-5):
        self.spec_shapes = spec_shapes
        self.channels = channels
        self.eps = eps
        # deterministic parameter init (matches nn.Parameter(ones/zeros))
        self.w_gammas, self.w_betas, self.v_gammas, self.v_betas = [], [], [], []
        for shp in spec_shapes:
            eff = int(channels * np.prod(shp[2:]))  # prod of filter dims (1 for mlp)
            self.w_gammas.append(jnp.ones((eff,), jnp.float32))
            self.w_betas.append(jnp.zeros((eff,), jnp.float32))
            self.v_gammas.append(jnp.ones((channels,), jnp.float32))
            self.v_betas.append(jnp.zeros((channels,), jnp.float32))

    def __call__(self, weights, biases):
        w_s, b_s = shape_wsfeat_symmetry(weights, biases, self.spec_shapes)
        out_w, out_b = [], []
        for i in range(len(self.spec_shapes)):
            out_w.append(channel_layer_norm(w_s[i], self.w_gammas[i], self.w_betas[i], self.eps))
            out_b.append(channel_layer_norm(b_s[i], self.v_gammas[i], self.v_betas[i], self.eps))
        return unshape_wsfeat_symmetry(out_w, out_b, self.spec_shapes)


# --------------------------------- main ----------------------------------- #
if __name__ == "__main__":
    key = jax.random.PRNGKey(0)
    channels, batch = 4, 2
    # network spec: conv layer (32 out, 32 in, 3x3) then mlp layer (16 out, 32 in)
    # (position extents 32*32=1024 and 16*32=512 -> both weight paths exercise
    #  the Pallas kernel; the bias tensors take the tiny-tensor jnp path.)
    spec_shapes = [(32, 32, 3, 3), (16, 32)]
    k1, k2, k3, k4, k5 = jax.random.split(key, 5)
    weights = [
        jax.random.normal(k1, (batch, channels, 32, 32, 3, 3), jnp.float32),
        jax.random.normal(k2, (batch, channels, 16, 32), jnp.float32),
    ]
    biases = [
        jax.random.normal(k3, (batch, channels, 32), jnp.float32),
        jax.random.normal(k4, (batch, channels, 16), jnp.float32),
    ]

    mod = SimpleLayerNormPallas(spec_shapes, channels)
    out_w, out_b = mod(weights, biases)
    jax.block_until_ready(out_w)
    jax.block_until_ready(out_b)

    # pure-JAX reference (mirrors torch semantics: unbiased std, std + eps)
    def ref_cln(x, g, b, eps=1e-5):
        xc = jnp.moveaxis(x, 1, -1)
        mean = xc.mean(-1, keepdims=True)
        std = jnp.sqrt(jnp.sum((xc - mean) ** 2, -1, keepdims=True) / (xc.shape[-1] - 1))
        return jnp.moveaxis((xc - mean) / (std + eps) * g + b, -1, 1)

    w_s, b_s = shape_wsfeat_symmetry(weights, biases, spec_shapes)
    ref_w = [ref_cln(w_s[i], mod.w_gammas[i], mod.w_betas[i]) for i in range(len(spec_shapes))]
    ref_b = [ref_cln(b_s[i], mod.v_gammas[i], mod.v_betas[i]) for i in range(len(spec_shapes))]
    ref_w, ref_b = unshape_wsfeat_symmetry(ref_w, ref_b, spec_shapes)
    for a, r in zip(out_w + out_b, ref_w + ref_b):
        np.testing.assert_allclose(np.asarray(a), np.asarray(r), atol=1e-5, rtol=1e-5)

    # Direct check of the Pallas path on a standalone (b, c, h, w) tensor with a
    # non-trivial gamma/beta and a shape guaranteed to exceed the tiny-M cutoff.
    xd = jax.random.normal(k5, (2, 4, 32, 32), jnp.float32) + 3.0  # offset stresses variance path
    gd = jnp.linspace(0.5, 1.5, 4, dtype=jnp.float32)
    bd = jnp.linspace(-0.25, 0.25, 4, dtype=jnp.float32)
    yd = channel_layer_norm(xd, gd, bd)
    jax.block_until_ready(yd)
    np.testing.assert_allclose(np.asarray(yd), np.asarray(ref_cln(xd, gd, bd)),
                               atol=1e-5, rtol=1e-5)

    print("KERNEL_OK")
</pallas_src>

<mosaic_0001>
module attributes {stable_mosaic.version = 11 : i64} {
  func.func @_channel_ln_kernel(%arg0: i32, %arg1: i32, %arg2: memref<1x36x512xf32, #tpu.memory_space<vmem>>, %arg3: memref<36x1xf32, #tpu.memory_space<vmem>>, %arg4: memref<36x1xf32, #tpu.memory_space<vmem>>, %arg5: memref<1x36x512xf32, #tpu.memory_space<vmem>>) attributes {dimension_semantics = [#tpu.dimension_semantics<parallel>, #tpu.dimension_semantics<parallel>], iteration_bounds = array<i64: 2, 2>, scalar_prefetch = 0 : i64, scratch_operands = 0 : i64, tpu.core_type = #tpu.core_type<tc>, window_params = [{transform_indices = @transform_0, window_bounds = array<i64: 1, 36, 512>}, {pipeline_mode = #tpu.pipeline_mode<synchronous>, transform_indices = @transform_1, window_bounds = array<i64: 36, 1>}, {pipeline_mode = #tpu.pipeline_mode<synchronous>, transform_indices = @transform_2, window_bounds = array<i64: 36, 1>}, {transform_indices = @transform_3, window_bounds = array<i64: 1, 36, 512>}]} {
    %c0 = arith.constant 0 : index
    %c0_0 = arith.constant 0 : index
    %c0_1 = arith.constant 0 : index
    %0 = vector.load %arg2[%c0, %c0_0, %c0_1] : memref<1x36x512xf32, #tpu.memory_space<vmem>>, vector<1x36x512xf32>
    %1 = vector.shape_cast %0 : vector<1x36x512xf32> to vector<36x512xf32>
    %cst = arith.constant dense<0.000000e+00> : vector<512xf32>
    %2 = vector.multi_reduction <add>, %1, %cst [0] : vector<36x512xf32> to vector<512xf32>
    %3 = vector.shape_cast %2 : vector<512xf32> to vector<1x512xf32>
    %cst_2 = arith.constant 0.027777778 : f32
    %4 = vector.broadcast %cst_2 : f32 to vector<1x512xf32>
    %5 = arith.mulf %3, %4 : vector<1x512xf32>
    %6 = vector.broadcast %5 : vector<1x512xf32> to vector<36x512xf32>
    %7 = arith.subf %1, %6 : vector<36x512xf32>
    %8 = arith.mulf %7, %7 : vector<36x512xf32>
    %cst_3 = arith.constant dense<0.000000e+00> : vector<512xf32>
    %9 = vector.multi_reduction <add>, %8, %cst_3 [0] : vector<36x512xf32> to vector<512xf32>
    %10 = vector.shape_cast %9 : vector<512xf32> to vector<1x512xf32>
    %cst_4 = arith.constant 0.0285714287 : f32
    %11 = vector.broadcast %cst_4 : f32 to vector<1x512xf32>
    %12 = arith.mulf %10, %11 : vector<1x512xf32>
    %13 = math.sqrt %12 : vector<1x512xf32>
    %cst_5 = arith.constant 9.99999974E-6 : f32
    %14 = vector.broadcast %cst_5 : f32 to vector<1x512xf32>
    %15 = arith.addf %13, %14 : vector<1x512xf32>
    %16 = tpu.reciprocal %15 : vector<1x512xf32> -> vector<1x512xf32>
    %17 = vector.broadcast %16 : vector<1x512xf32> to vector<36x512xf32>
    %18 = arith.mulf %7, %17 : vector<36x512xf32>
    %c0_6 = arith.constant 0 : index
    %c0_7 = arith.constant 0 : index
    %19 = vector.load %arg3[%c0_6, %c0_7] : memref<36x1xf32, #tpu.memory_space<vmem>>, vector<36x1xf32>
    %20 = vector.broadcast %19 : vector<36x1xf32> to vector<36x512xf32>
    %21 = arith.mulf %18, %20 : vector<36x512xf32>
    %c0_8 = arith.constant 0 : index
    %c0_9 = arith.constant 0 : index
    %22 = vector.load %arg4[%c0_8, %c0_9] : memref<36x1xf32, #tpu.memory_space<vmem>>, vector<36x1xf32>
    %23 = vector.broadcast %22 : vector<36x1xf32> to vector<36x512xf32>
    %24 = arith.addf %21, %23 : vector<36x512xf32>
    %c0_10 = arith.constant 0 : index
    %c0_11 = arith.constant 0 : index
    %c0_12 = arith.constant 0 : index
    %25 = vector.load %arg5[%c0_10, %c0_11, %c0_12] : memref<1x36x512xf32, #tpu.memory_space<vmem>>, vector<1x36x512xf32>
    %26 = vector.shape_cast %25 : vector<1x36x512xf32> to vector<36x512xf32>
    %27 = vector.shape_cast %24 : vector<36x512xf32> to vector<1x36x512xf32>
    tpu.vector_store %arg5[%c0_10, %c0_11, %c0_12], %27 {strides = array<i32>} : memref<1x36x512xf32, #tpu.memory_space<vmem>>, vector<1x36x512xf32>,
    return
  }
  func.func @transform_0(%arg0: i32, %arg1: i32) -> (i32, i32, i32) {
    %c0_i32 = arith.constant 0 : i32
    %c0_i32_0 = arith.constant 0 : i32
    return %arg0, %c0_i32, %arg1 : i32, i32, i32
  }
  func.func @transform_1(%arg0: i32, %arg1: i32) -> (i32, i32) {
    %c0_i32 = arith.constant 0 : i32
    %c0_i32_0 = arith.constant 0 : i32
    %c0_i32_1 = arith.constant 0 : i32
    return %c0_i32, %c0_i32_0 : i32, i32
  }
  func.func @transform_2(%arg0: i32, %arg1: i32) -> (i32, i32) {
    %c0_i32 = arith.constant 0 : i32
    %c0_i32_0 = arith.constant 0 : i32
    %c0_i32_1 = arith.constant 0 : i32
    return %c0_i32, %c0_i32_0 : i32, i32
  }
  func.func @transform_3(%arg0: i32, %arg1: i32) -> (i32, i32, i32) {
    %c0_i32 = arith.constant 0 : i32
    %c0_i32_0 = arith.constant 0 : i32
    return %arg0, %c0_i32, %arg1 : i32, i32, i32
  }
}

</mosaic_0001>

<bundles_post_ra>
// kernel: tpu_custom_call.1
= control target key start
LH: loop header
LB: loop body
LE: loop exit
PB: predicated region body
PF: predicated region fallthrough
CT: control target
= control target key end

     0   :  { %s884_s12 = smov 0   ;;  %s886_s13 = smov 0   ;;  %s1316_s0 = inlined_call_operand.vmem [shape: f32[2,36,1024], index: 0, kind: input, shape index: {}]   ;;  %s1317_s1 = inlined_call_operand.vmem [shape: f32[36,1], index: 1, kind: input, shape index: {}]   ;;  %s1318_s2 = inlined_call_operand.vmem [shape: f32[36,1], index: 2, kind: input, shape index: {}]   ;;  %s1319_s3 = inlined_call_operand.vmem [shape: f32[2,36,1024], index: 3, kind: output, shape index: {}]  }
   0x1   :  { %s888_s14 = smov 0   ;;  %s890_s15 = smov 0  }
   0x2   :  { %s892_s16 = smov 0   ;;  %s894_s17 = smov 0  }
   0x3   :  { %s896_s18 = smov 0  }
   0x4 LB: > { %s22_s19 = sadd.s32 1, %s853_s16  ;;  %s25_s20 = sadd.s32 1, %s857_s17  ;;  %s861_s18 = sphi %s896_s18, %s13_s18   ;;  %s857_s17 = sphi %s894_s17, %s1326_s17   ;;  %s853_s16 = sphi %s892_s16, %s1325_s16   ;;  %s849_s15 = sphi %s890_s15, %s1324_s15   ;;  %s845_s14 = sphi %s888_s14, %s1323_s14   ;;  %s841_s13 = sphi %s886_s13, %s1322_s13   ;;  %s837_s12 = sphi %s884_s12, %s1321_s12  }
   0x5   : > { %p23_p0 = scmp.ge.s32.totalorder %s22_s19, 2  ;;  %s717_s21 = sadd.s32 4294967295, %s861_s18  }
   0x6   : > { %p41_p1 = scmp.ne.s32.totalorder %s841_s13, %s837_s12  ;;  %p42_p2 = scmp.eq.s32.totalorder %s861_s18, 0 }
   0x7   : > { %s1328_s19 = smov (%p23_p0, %s22_s19), 0  ;;  %s1330_s20 = smov (!%p23_p0, %s25_s20), %s857_s17 }
   0x8   : > { %p27_p3 = scmp.ge.s32.totalorder %s1330_s20, 2  ;;  %p115_p4 = scmp.eq.s32.totalorder %s717_s21, 3 }
   0x9   : > { %s30_s22 = ssub.s32 %s853_s16, %s1328_s19  ;;  %p43_p5 = por %p42_p2, %p41_p1 }
   0xa   : > { %s1332_s20 = smov (%p27_p3, %s1330_s20), 0  ;;  %p932_p6 = por %p115_p4, %p41_p1 }
   0xb   : > { %s29_s24 = ssub.s32 %s857_s17, %s1332_s20  ;;  %s34_s26 = sadd.s32 1, %s841_s13 }
   0xc   : > { %s31_s25 = sor.u32 %s30_s22, %s29_s24  ;;  %p720_p8 = scmp.ge.s32.totalorder %s861_s18, 4 }
   0xd   : > { %p32_p7 = scmp.eq.s32.totalorder %s31_s25, 0 }
   0xe   : > { %143 = sbr.rel (%p720_p8) target bundleno = 37 (0x25), region = 24 }
   0xf   : > { %s940_s27 = scalar_select %p32_p7, %s841_s13, %s34_s26  }
  0x13   : > { %146 = sbr.rel (!%p43_p5) target bundleno = 37 (0x25), region = 28  ;;  %s148_s28 = sand.u32 (%p43_p5), 1, %s841_s13  }
  0x14   : > { %s728_s29 = smul.u32 (%p43_p5), 160, %s148_s28  ;;  %s721_s30 = sshll.u32 (%p43_p5), %s853_s16, 2 }
  0x15   : > { %s729_s4 = smul.u32 (%p43_p5), 40, %s857_s17 }
  0x16   : > { %s954_s10 = scalar_lea.vmem (%p43_p5), [#allocation2], %s728_s29 }
  0x17   : > { %s153_s5 = sadd.s32 (%p43_p5), %s729_s4, %s721_s30 }
  0x18   : > { %s722_s6 = sshll.u32 %s153_s5, 3 }
  0x19   : > { %s949_s9 = scalar_lea.vmem %s1316_s0, %s722_s6 }
  0x1a   : > { %v168_v0 = vld [vmem:[%s949_s9] sm:$0xff]  ;;  %v170_v1 = vld [vmem:[%s949_s9 + $0x8] sm:$0xff]  ;;  %v172_v2 = vld [vmem:[%s949_s9 + $0x10] sm:$0xff] }
  0x1b   : > { %169 = vst [vmem:[%s954_s10] sm:$0xff] %v168_v0  ;;  %171 = vst [vmem:[%s954_s10 + $0x8] sm:$0xff] %v170_v1  ;;  %v174_v3 = vld [vmem:[%s949_s9 + $0x18] sm:$0xff]  ;;  %v176_v4 = vld [vmem:[%s949_s9 + $0x40] sm:$0xff] }
  0x1c   : > { %173 = vst [vmem:[%s954_s10 + $0x10] sm:$0xff] %v172_v2  ;;  %v178_v5 = vld [vmem:[%s949_s9 + $0x48] sm:$0xff]  ;;  %175 = vst [vmem:[%s954_s10 + $0x18] sm:$0xff] %v174_v3  ;;  %v180_v6 = vld [vmem:[%s949_s9 + $0x50] sm:$0xff] }
  0x1d   : > { %177 = vst [vmem:[%s954_s10 + $0x20] sm:$0xff] %v176_v4  ;;  %179 = vst [vmem:[%s954_s10 + $0x28] sm:$0xff] %v178_v5  ;;  %v182_v7 = vld [vmem:[%s949_s9 + $0x58] sm:$0xff]  ;;  %v184_v8 = vld [vmem:[%s949_s9 + $0x80] sm:$0xff] }
  0x1e   : > { %181 = vst [vmem:[%s954_s10 + $0x30] sm:$0xff] %v180_v6  ;;  %183 = vst [vmem:[%s954_s10 + $0x38] sm:$0xff] %v182_v7  ;;  %v186_v9 = vld [vmem:[%s949_s9 + $0x88] sm:$0xff]  ;;  %v188_v10 = vld [vmem:[%s949_s9 + $0x90] sm:$0xff] }
  0x1f   : > { %185 = vst [vmem:[%s954_s10 + $0x40] sm:$0xff] %v184_v8  ;;  %v190_v11 = vld [vmem:[%s949_s9 + $0x98] sm:$0xff]  ;;  %187 = vst [vmem:[%s954_s10 + $0x48] sm:$0xff] %v186_v9  ;;  %v192_v12 = vld [vmem:[%s949_s9 + $0xc0] sm:$0xff] }
  0x20   : > { %189 = vst [vmem:[%s954_s10 + $0x50] sm:$0xff] %v188_v10  ;;  %191 = vst [vmem:[%s954_s10 + $0x58] sm:$0xff] %v190_v11  ;;  %v194_v13 = vld [vmem:[%s949_s9 + $0xc8] sm:$0xff]  ;;  %v196_v14 = vld [vmem:[%s949_s9 + $0xd0] sm:$0xff] }
  0x21   : > { %193 = vst [vmem:[%s954_s10 + $0x60] sm:$0xff] %v192_v12  ;;  %195 = vst [vmem:[%s954_s10 + $0x68] sm:$0xff] %v194_v13  ;;  %v198_v15 = vld [vmem:[%s949_s9 + $0xd8] sm:$0xff]  ;;  %v200_v16 = vld [vmem:[%s949_s9 + $0x100] sm:$0xff] }
  0x22   : > { %197 = vst [vmem:[%s954_s10 + $0x70] sm:$0xff] %v196_v14  ;;  %v202_v17 = vld [vmem:[%s949_s9 + $0x108] sm:$0xff]  ;;  %199 = vst [vmem:[%s954_s10 + $0x78] sm:$0xff] %v198_v15  ;;  %v204_v18 = vld [vmem:[%s949_s9 + $0x110] sm:$0xff] }
  0x23   : > { %201 = vst [vmem:[%s954_s10 + $0x80] sm:$0xff] %v200_v16  ;;  %203 = vst [vmem:[%s954_s10 + $0x88] sm:$0xff] %v202_v17  ;;  %v206_v19 = vld [vmem:[%s949_s9 + $0x118] sm:$0xff] }
  0x24   : > { %205 = vst [vmem:[%s954_s10 + $0x90] sm:$0xff] %v204_v18  ;;  %207 = vst [vmem:[%s954_s10 + $0x98] sm:$0xff] %v206_v19 }
  0x25 PF: > { %p723_p9 = scmp.ge.s32.totalorder %s861_s18, 1  ;;  %p212_p10 = scmp.lt.s32.totalorder %s861_s18, 5 }
  0x27   : > { %p213_p11 = pnand %p723_p9, %p212_p10 }
  0x28   : > { %s219_s25 = sand.u32 (!%p213_p11), 1, %s837_s12  }
  0x29   : > { %216 = sbr.rel (%p213_p11) target bundleno = 204 (0xcc), region = 51 }
  0x2a   : > { %s1002_s26 = smul.u32 (!%p213_p11), 160, %s219_s25 }
  0x2c   : > { %s1011_s5 = scalar_lea.vmem (!%p213_p11), [#allocation2], %s1002_s26  ;;  %s1242_s29 = scalar_lea.vmem (!%p213_p11), [#allocation3], %s1002_s26 }
  0x2e   : > { %v458_v20 = vld [vmem:[%s1317_s1 + $0x10] sm:$0xff]  ;;  %v456_v21 = vld [vmem:[%s1317_s1] sm:$0xff]  ;;  %v863_v22 = vmov 0   ;;  %v459_v23 = vld [vmem:[%s1317_s1 + $0x18] sm:$0xff]  ;;  %vm266_vm0 = vcmask 1043456   ;;  %s724_s26 = sshll.u32 (%p932_p6), %s845_s14, 2 }
  0x2f   : > { %790 = vset.pattern.permute.xlu1 %v863_v22  ;;  %789 = vset.pattern.permute.xlu0 %v863_v22  ;;  %v457_v24 = vld [vmem:[%s1317_s1 + $0x8] sm:$0xff]  ;;  %v1014_v25 = vld [vmem:[%s1011_s5] sm:$0xff]  ;;  %v1020_v27 = vld [vmem:[%s1011_s5 + $0x10] sm:$0xff]  ;;  %s731_s30 = smul.u32 (%p932_p6), 40, %s849_s15 }
  0x30   : > { %473 = vperm.xlu1 %790, %v458_v20   ;;  %463 = vperm.xlu0 %789, %v456_v21   ;;  %v1017_v26 = vld [vmem:[%s1011_s5 + $0x8] sm:$0xff]  ;;  %v506_v28 = vld [vmem:[%s1318_s2] sm:$0xff]  ;;  %v1029_v30 = vld [vmem:[%s1011_s5 + $0x18] sm:$0xff] }
  0x31   : > { %v460_v29 = vld [vmem:[%s1317_s1 + $0x20] sm:$0xf]  ;;  %v1035_v32 = vld [vmem:[%s1011_s5 + $0x28] sm:$0xff]  ;;  %v1038_v33 = vld [vmem:[%s1011_s5 + $0x30] sm:$0xff]  ;;  %s585_s23 = sadd.s32 (%p932_p6), %s731_s30, %s724_s26 }
  0x32   : > { %v1032_v31 = vld [vmem:[%s1011_s5 + $0x20] sm:$0xff]  ;;  %v1041_v34 = vld [vmem:[%s1011_s5 + $0x38] sm:$0xff]  ;;  %v275_v37 = vadd.f32 %v1035_v32, %v1017_v26  ;;  %v1051_v38 = vld [vmem:[%s1011_s5 + $0x48] sm:$0xff]  ;;  %v286_v41 = vadd.f32 %v1038_v33, %v1020_v27  ;;  %s725_s4 = sshll.u32 (%p932_p6), %s585_s23, 3 }
  0x33   : > { %v1044_v35 = vld [vmem:[%s1011_s5 + $0x40] sm:$0xff]  ;;  %v263_v36 = vadd.f32 %v1032_v31, %v1014_v25  ;;  %v1054_v39 = vld [vmem:[%s1011_s5 + $0x50] sm:$0xff]  ;;  %v1057_v40 = vld [vmem:[%s1011_s5 + $0x58] sm:$0xff]  ;;  %v297_v42 = vadd.f32 %v1041_v34, %v1029_v30  ;;  %s587_s15 = scalar_lea.vmem (%p932_p6), %s1319_s3, %s725_s4 }
  0x34   : > { %478 = vperm.xlu1 %790, %v459_v23   ;;  %468 = vperm.xlu0 %789, %v457_v24   ;;  %v1064_v43 = vld [vmem:[%s1011_s5 + $0x60] sm:$0xff]  ;;  %v1067_v44 = vld [vmem:[%s1011_s5 + $0x68] sm:$0xff]  ;;  %v1070_v45 = vld [vmem:[%s1011_s5 + $0x70] sm:$0xff]  ;;  %v276_v47 = vadd.f32 %v275_v37, %v1051_v38  ;;  %v287_v51 = vadd.f32 %v286_v41, %v1054_v39 }
  0x35   : > { %v264_v46 = vadd.f32 %v263_v36, %v1044_v35  ;;  %v1075_v48 = vld [vmem:[%s1011_s5 + $0x78] sm:$0xff]  ;;  %v1078_v49 = vld [vmem:[%s1011_s5 + $0x80] sm:$0xf]  ;;  %v1081_v50 = vld [vmem:[%s1011_s5 + $0x88] sm:$0xf]  ;;  %v298_v52 = vadd.f32 %v297_v42, %v1057_v40 }
  0x36   : > { %v1086_v53 = vld [vmem:[%s1011_s5 + $0x90] sm:$0xf]  ;;  %v1089_v54 = vld [vmem:[%s1011_s5 + $0x98] sm:$0xf]  ;;  %v267_v56 = vsel %vm266_vm0, %v1078_v49, 0.0  ;;  %v277_v57 = vadd.f32 %v276_v47, %v1067_v44  ;;  %v278_v58 = vsel %vm266_vm0, %v1081_v50, 0.0  ;;  %v288_v61 = vadd.f32 %v287_v51, %v1070_v45 }
  0x37   : > { %v265_v55 = vadd.f32 %v264_v46, %v1064_v43  ;;  %v508_v59 = vld [vmem:[%s1318_s2 + $0x10] sm:$0xff]  ;;  %v507_v60 = vld [vmem:[%s1318_s2 + $0x8] sm:$0xff]  ;;  %v289_v62 = vsel %vm266_vm0, %v1086_v53, 0.0  ;;  %v299_v63 = vadd.f32 %v298_v52, %v1075_v48  ;;  %v300_v0 = vsel %vm266_vm0, %v1089_v54, 0.0  ;;  %v510_v7 = vld [vmem:[%s1318_s2 + $0x20] sm:$0xf] }
  0x38   : > { %513 = vperm.xlu1 %790, %v506_v28   ;;  %483 = vperm.xlu0 %789, %v460_v29   ;;  %v279_v2 = vadd.f32 %v278_v58, %v277_v57  ;;  %v290_v3 = vadd.f32 %v289_v62, %v288_v61  ;;  %v509_v8 = vld [vmem:[%s1318_s2 + $0x18] sm:$0xff] }
  0x39   : > { %v268_v1 = vadd.f32 %v267_v56, %v265_v55  ;;  %v301_v4 = vadd.f32 %v300_v0, %v299_v63 }
  0x3a   : > { %v280_v6 = vrot.slane %v279_v2, 4  ;;  %v291_v9 = vrot.slane %v290_v3, 4 }
  0x3b   : > { %v269_v5 = vrot.slane %v268_v1, 4  ;;  %v302_v10 = vrot.slane %v301_v4, 4 }
  0x3c   : > { %523 = vperm.xlu1 %790, %v508_v59   ;;  %518 = vperm.xlu0 %789, %v507_v60   ;;  %v281_v12 = vadd.f32 %v280_v6, %v279_v2  ;;  %v292_v13 = vadd.f32 %v291_v9, %v290_v3 }
  0x3d   : > { %v270_v11 = vadd.f32 %v269_v5, %v268_v1  ;;  %v303_v14 = vadd.f32 %v302_v10, %v301_v4 }
  0x3e   : > { %v282_v16 = vrot.slane %v281_v12, 2  ;;  %v293_v17 = vrot.slane %v292_v13, 2 }
  0x3f   : > { %v271_v15 = vrot.slane %v270_v11, 2  ;;  %v304_v18 = vrot.slane %v303_v14, 2 }
  0x40   : > { %533 = vperm.xlu1 %790, %v510_v7   ;;  %528 = vperm.xlu0 %789, %v509_v8   ;;  %v283_v20 = vadd.f32 %v282_v16, %v281_v12  ;;  %v294_v21 = vadd.f32 %v293_v17, %v292_v13 }
  0x41   : > { %v272_v19 = vadd.f32 %v271_v15, %v270_v11  ;;  %v305_v22 = vadd.f32 %v304_v18, %v303_v14 }
  0x42   : > { %v284_v24 = vrot.slane %v283_v20, 1  ;;  %v295_v28 = vrot.slane %v294_v21, 1 }
  0x43   : > { %v273_v23 = vrot.slane %v272_v19, 1  ;;  %v306_v29 = vrot.slane %v305_v22, 1 }
  0x44   : > { %v285_v37 = vadd.f32 %v284_v24, %v283_v20  ;;  %v296_v41 = vadd.f32 %v295_v28, %v294_v21 }
  0x45   : > { %v274_v36 = vadd.f32 %v273_v23, %v272_v19  ;;  %v307_v42 = vadd.f32 %v306_v29, %v305_v22 }
  0x46   : > { %v309_v47 = vmul.f32 0.027777778, %v285_v37  ;;  %v310_v51 = vmul.f32 0.027777778, %v296_v41 }
  0x47   : > { %v308_v46 = vmul.f32 0.027777778, %v274_v36  ;;  %v311_v52 = vmul.f32 0.027777778, %v307_v42 }
  0x48   : > { %v1119_v56 = vsub.f32 %v1017_v26, %v309_v47  ;;  %v1122_v57 = vsub.f32 %v1020_v27, %v310_v51  ;;  %v1131_v60 = vsub.f32 %v1035_v32, %v309_v47  ;;  %v1134_v61 = vsub.f32 %v1038_v33, %v310_v51 }
  0x49   : > { %v1116_v55 = vsub.f32 %v1014_v25, %v308_v46  ;;  %v1125_v58 = vsub.f32 %v1029_v30, %v311_v52  ;;  %v1128_v59 = vsub.f32 %v1032_v31, %v308_v46  ;;  %v1137_v25 = vsub.f32 %v1041_v34, %v311_v52 }
  0x4a   : > { %v1140_v26 = vsub.f32 %v1044_v35, %v308_v46  ;;  %v1143_v27 = vsub.f32 %v1051_v38, %v309_v47  ;;  %v1146_v30 = vsub.f32 %v1054_v39, %v310_v51  ;;  %v1149_v31 = vsub.f32 %v1057_v40, %v311_v52 }
  0x4b   : > { %v332_v32 = vmul.f32 %v1116_v55, %v1116_v55  ;;  %v333_v33 = vmul.f32 %v1119_v56, %v1119_v56  ;;  %v334_v34 = vmul.f32 %v1122_v57, %v1122_v57  ;;  %v335_v35 = vmul.f32 %v1125_v58, %v1125_v58 }
  0x4c   : > { %v336_v38 = vmul.f32 %v1128_v59, %v1128_v59  ;;  %v337_v39 = vmul.f32 %v1131_v60, %v1131_v60  ;;  %v338_v40 = vmul.f32 %v1134_v61, %v1134_v61  ;;  %v339_v62 = vmul.f32 %v1137_v25, %v1137_v25 }
  0x4d   : > { %v1168_v63 = vsub.f32 %v1064_v43, %v308_v46  ;;  %v1171_v0 = vsub.f32 %v1067_v44, %v309_v47  ;;  %v1174_v1 = vsub.f32 %v1070_v45, %v310_v51  ;;  %v1177_v2 = vsub.f32 %v1075_v48, %v311_v52 }
  0x4e   : > { %v1180_v3 = vsub.f32 %v1078_v49, %v308_v46  ;;  %v340_v4 = vmul.f32 %v1140_v26, %v1140_v26  ;;  %v341_v5 = vmul.f32 %v1143_v27, %v1143_v27  ;;  %v1187_v43 = vsub.f32 %v1081_v50, %v309_v47 }
  0x4f   : > { %v1190_v44 = vsub.f32 %v1086_v53, %v310_v51  ;;  %v342_v45 = vmul.f32 %v1146_v30, %v1146_v30  ;;  %v343_v48 = vmul.f32 %v1149_v31, %v1149_v31  ;;  %v352_v49 = vadd.f32 %v336_v38, %v332_v32 }
  0x50   : > { %v363_v6 = vadd.f32 %v337_v39, %v333_v33  ;;  %v374_v7 = vadd.f32 %v338_v40, %v334_v34  ;;  %v385_v8 = vadd.f32 %v339_v62, %v335_v35  ;;  %v1197_v9 = vsub.f32 %v1089_v54, %v311_v52 }
  0x51   : > { %v344_v50 = vmul.f32 %v1168_v63, %v1168_v63  ;;  %v345_v53 = vmul.f32 %v1171_v0, %v1171_v0  ;;  %v348_v10 = vmul.f32 %v1180_v3, %v1180_v3  ;;  %v353_v11 = vadd.f32 %v352_v49, %v340_v4 }
  0x52   : > { %v364_v12 = vadd.f32 %v363_v6, %v341_v5  ;;  %v346_v13 = vmul.f32 %v1174_v1, %v1174_v1  ;;  %v349_v14 = vmul.f32 %v1187_v43, %v1187_v43  ;;  %v375_v15 = vadd.f32 %v374_v7, %v342_v45 }
  0x53   : > { %v347_v54 = vmul.f32 %v1177_v2, %v1177_v2  ;;  %v350_v16 = vmul.f32 %v1190_v44, %v1190_v44  ;;  %v386_v17 = vadd.f32 %v385_v8, %v343_v48  ;;  %v351_v18 = vmul.f32 %v1197_v9, %v1197_v9 }
  0x54   : > { %v354_v19 = vadd.f32 %v353_v11, %v344_v50  ;;  %v355_v20 = vsel %vm266_vm0, %v348_v10, 0.0  ;;  %v365_v21 = vadd.f32 %v364_v12, %v345_v53  ;;  %v366_v22 = vsel %vm266_vm0, %v349_v14, 0.0 }
  0x55   : > { %v376_v23 = vadd.f32 %v375_v15, %v346_v13  ;;  %v377_v24 = vsel %vm266_vm0, %v350_v16, 0.0  ;;  %v387_v28 = vadd.f32 %v386_v17, %v347_v54  ;;  %v388_v36 = vsel %vm266_vm0, %v351_v18, 0.0 }
  0x56   : > { %v356_v29 = vadd.f32 %v355_v20, %v354_v19  ;;  %v367_v37 = vadd.f32 %v366_v22, %v365_v21 }
  0x57   : > { %v378_v41 = vadd.f32 %v377_v24, %v376_v23  ;;  %v389_v42 = vadd.f32 %v388_v36, %v387_v28 }
  0x58   : > { %v357_v46 = vrot.slane %v356_v29, 4  ;;  %v368_v47 = vrot.slane %v367_v37, 4 }
  0x59   : > { %v379_v51 = vrot.slane %v378_v41, 4  ;;  %v390_v52 = vrot.slane %v389_v42, 4 }
  0x5a   : > { %v358_v32 = vadd.f32 %v357_v46, %v356_v29  ;;  %v369_v33 = vadd.f32 %v368_v47, %v367_v37 }
  0x5b   : > { %v380_v34 = vadd.f32 %v379_v51, %v378_v41  ;;  %v391_v35 = vadd.f32 %v390_v52, %v389_v42 }
  0x5c   : > { %v359_v38 = vrot.slane %v358_v32, 2  ;;  %v370_v39 = vrot.slane %v369_v33, 2 }
  0x5d   : > { %v381_v40 = vrot.slane %v380_v34, 2  ;;  %v392_v62 = vrot.slane %v391_v35, 2 }
  0x5e   : > { %v360_v4 = vadd.f32 %v359_v38, %v358_v32  ;;  %v371_v5 = vadd.f32 %v370_v39, %v369_v33 }
  0x5f   : > { %v382_v45 = vadd.f32 %v381_v40, %v380_v34  ;;  %v393_v48 = vadd.f32 %v392_v62, %v391_v35 }
  0x60   : > { %v361_v49 = vrot.slane %v360_v4, 1  ;;  %v372_v6 = vrot.slane %v371_v5, 1 }
  0x61   : > { %v383_v7 = vrot.slane %v382_v45, 1  ;;  %v394_v8 = vrot.slane %v393_v48, 1 }
  0x62   : > { %v362_v50 = vadd.f32 %v361_v49, %v360_v4  ;;  %v373_v53 = vadd.f32 %v372_v6, %v371_v5 }
  0x63   : > { %v384_v10 = vadd.f32 %v383_v7, %v382_v45  ;;  %v395_v11 = vadd.f32 %v394_v8, %v393_v48 }
  0x64   : > { %v396_v12 = vmul.f32 0.028571429, %v362_v50  ;;  %v397_v13 = vmul.f32 0.028571429, %v373_v53 }
  0x65   : > { %v398_v14 = vmul.f32 0.028571429, %v384_v10  ;;  %v399_v15 = vmul.f32 0.028571429, %v395_v11 }
  0x66   : > { %791 = vrsqrt.f32 %v396_v12  ;;  %vm402_vm1 = vcmp.eq.f32.partialorder %v396_v12, inf  ;;  %vm409_vm2 = vcmp.eq.f32.partialorder %v397_v13, inf  ;;  %v405_v22 = vand.u32 2147483648, %v396_v12 }
  0x67   : > { %793 = vrsqrt.f32 %v397_v13  ;;  %vm416_vm3 = vcmp.eq.f32.partialorder %v398_v14, inf  ;;  %vm404_vm4 = vcmp.eq.f32.partialorder %v396_v12, 0.0  ;;  %v412_v28 = vand.u32 2147483648, %v397_v13 }
  0x68   : > { %795 = vrsqrt.f32 %v398_v14  ;;  %vm423_vm5 = vcmp.eq.f32.partialorder %v399_v15, inf  ;;  %vm411_vm6 = vcmp.eq.f32.partialorder %v397_v13, 0.0  ;;  %v419_v36 = vand.u32 2147483648, %v398_v14 }
  0x69   : > { %797 = vrsqrt.f32 %v399_v15  ;;  %vm418_vm7 = vcmp.eq.f32.partialorder %v398_v14, 0.0  ;;  %v426_v41 = vand.u32 2147483648, %v399_v15  ;;  %vm425_vm8 = vcmp.eq.f32.partialorder %v399_v15, 0.0 }
  0x73   : > { %v792_v54 = vpop.eup %791 }
  0x74   : > { %v794_v16 = vpop.eup %793  ;;  %v401_v19 = vmul.f32 %v792_v54, %v396_v12 }
  0x75   : > { %v796_v17 = vpop.eup %795  ;;  %v408_v20 = vmul.f32 %v794_v16, %v397_v13 }
  0x76   : > { %v798_v18 = vpop.eup %797  ;;  %v415_v21 = vmul.f32 %v796_v17, %v398_v14  ;;  %v403_v24 = vsel %vm402_vm1, %v396_v12, %v401_v19 }
  0x77   : > { %v422_v23 = vmul.f32 %v798_v18, %v399_v15  ;;  %v410_v29 = vsel %vm409_vm2, %v397_v13, %v408_v20  ;;  %v406_v42 = vsel %vm404_vm4, %v405_v22, %v403_v24 }
  0x78   : > { %v417_v37 = vsel %vm416_vm3, %v398_v14, %v415_v21  ;;  %v413_v47 = vsel %vm411_vm6, %v412_v28, %v410_v29  ;;  %v428_v32 = vadd.f32 1e-05, %v406_v42 }
  0x79   : > { %v424_v46 = vsel %vm423_vm5, %v399_v15, %v422_v23  ;;  %v420_v51 = vsel %vm418_vm7, %v419_v36, %v417_v37  ;;  %v429_v33 = vadd.f32 1e-05, %v413_v47 }
  0x7a   : > { %v427_v52 = vsel %vm425_vm8, %v426_v41, %v424_v46  ;;  %v430_v34 = vadd.f32 1e-05, %v420_v51  ;;  %799 = vrcp.f32 %v428_v32 }
  0x7b   : > { %v431_v35 = vadd.f32 1e-05, %v427_v52  ;;  %801 = vrcp.f32 %v429_v33 }
  0x7c   : > { %803 = vrcp.f32 %v430_v34 }
  0x7d   : > { %805 = vrcp.f32 %v431_v35 }
  0x87   : > { %v800_v38 = vpop.eup %799 }
  0x88   : > { %v802_v39 = vpop.eup %801  ;;  %v436_v45 = vmul.f32 %v800_v38, %v1116_v55  ;;  %v444_v50 = vmul.f32 %v800_v38, %v1140_v26  ;;  %v440_v10 = vmul.f32 %v800_v38, %v1128_v59  ;;  %v452_v11 = vmul.f32 %v800_v38, %v1180_v3 }
  0x89   : > { %v804_v40 = vpop.eup %803  ;;  %v437_v48 = vmul.f32 %v802_v39, %v1119_v56  ;;  %v445_v53 = vmul.f32 %v802_v39, %v1143_v27  ;;  %v441_v56 = vmul.f32 %v802_v39, %v1131_v60  ;;  %v449_v18 = vmul.f32 %v802_v39, %v1171_v0 }
  0x8a   : > { %v806_v62 = vpop.eup %805  ;;  %v438_v49 = vmul.f32 %v804_v40, %v1122_v57  ;;  %v446_v12 = vmul.f32 %v804_v40, %v1146_v30  ;;  %v453_v57 = vmul.f32 %v802_v39, %v1187_v43  ;;  %v442_v26 = vmul.f32 %v804_v40, %v1134_v61 }
  0x8b   : > { %v439_v6 = vmul.f32 %v806_v62, %v1125_v58  ;;  %v447_v55 = vmul.f32 %v806_v62, %v1149_v31  ;;  %v443_v27 = vmul.f32 %v806_v62, %v1137_v25  ;;  %v454_v3 = vmul.f32 %v804_v40, %v1190_v44 }
  0x8c   : > { %v455_v30 = vmul.f32 %v806_v62, %v1197_v9  ;;  %v448_v43 = vmul.f32 %v800_v38, %v1168_v63  ;;  %v450_v19 = vmul.f32 %v804_v40, %v1174_v1  ;;  %v451_v61 = vmul.f32 %v806_v62, %v1177_v2 }
  0xab   : > { %v474_v4 = vpop.permute.xlu1 %473  ;;  %v464_v5 = vpop.permute.xlu0 %463 }
  0xac   : > { %v486_v58 = vmul.f32 %v464_v5, %v436_v45  ;;  %v487_v13 = vmul.f32 %v464_v5, %v437_v48  ;;  %v488_v14 = vmul.f32 %v464_v5, %v438_v49  ;;  %v489_v15 = vmul.f32 %v464_v5, %v439_v6 }
  0xad   : > { %v494_v25 = vmul.f32 %v474_v4, %v444_v50  ;;  %v495_v20 = vmul.f32 %v474_v4, %v445_v53  ;;  %v496_v21 = vmul.f32 %v474_v4, %v446_v12  ;;  %v497_v22 = vmul.f32 %v474_v4, %v447_v55 }
  0xaf   : > { %v1223_v7 = vpop.permute.xlu1 %478  ;;  %v469_v8 = vpop.permute.xlu0 %468 }
  0xb0   : > { %v490_v63 = vmul.f32 %v469_v8, %v440_v10  ;;  %v491_v0 = vmul.f32 %v469_v8, %v441_v56  ;;  %v492_v1 = vmul.f32 %v469_v8, %v442_v26  ;;  %v493_v2 = vmul.f32 %v469_v8, %v443_v27 }
  0xb1   : > { %v498_v34 = vmul.f32 %v1223_v7, %v448_v43  ;;  %v499_v35 = vmul.f32 %v1223_v7, %v449_v18  ;;  %v500_v38 = vmul.f32 %v1223_v7, %v450_v19  ;;  %v501_v39 = vmul.f32 %v1223_v7, %v451_v61 }
  0xb3   : > { %v514_v54 = vpop.permute.xlu1 %513  ;;  %v484_v59 = vpop.permute.xlu0 %483 }
  0xb4   : > { %v536_v31 = vadd.f32 %v514_v54, %v486_v58  ;;  %v537_v16 = vadd.f32 %v514_v54, %v487_v13  ;;  %v538_v60 = vadd.f32 %v514_v54, %v488_v14  ;;  %v539_v17 = vadd.f32 %v514_v54, %v489_v15 }
  0xb5   : > { %v502_v46 = vmul.f32 %v484_v59, %v452_v11  ;;  %v503_v47 = vmul.f32 %v484_v59, %v453_v57  ;;  %v504_v51 = vmul.f32 %v484_v59, %v454_v3  ;;  %v505_v52 = vmul.f32 %v484_v59, %v455_v30 }
  0xb6   : > { %556 = vst [vmem:[%s1242_s29] sm:$0xff] %v536_v31  ;;  %557 = vst [vmem:[%s1242_s29 + $0x8] sm:$0xff] %v537_v16 }
  0xb7   : > { %558 = vst [vmem:[%s1242_s29 + $0x10] sm:$0xff] %v538_v60  ;;  %559 = vst [vmem:[%s1242_s29 + $0x18] sm:$0xff] %v539_v17  ;;  %v524_v44 = vpop.permute.xlu1 %523  ;;  %v519_v9 = vpop.permute.xlu0 %518 }
  0xb8   : > { %v544_v23 = vadd.f32 %v524_v44, %v494_v25  ;;  %v545_v24 = vadd.f32 %v524_v44, %v495_v20  ;;  %v546_v28 = vadd.f32 %v524_v44, %v496_v21  ;;  %v547_v29 = vadd.f32 %v524_v44, %v497_v22 }
  0xb9   : > { %v540_v36 = vadd.f32 %v519_v9, %v490_v63  ;;  %v541_v37 = vadd.f32 %v519_v9, %v491_v0  ;;  %v542_v41 = vadd.f32 %v519_v9, %v492_v1  ;;  %v543_v42 = vadd.f32 %v519_v9, %v493_v2 }
  0xba   : > { %564 = vst [vmem:[%s1242_s29 + $0x40] sm:$0xff] %v544_v23  ;;  %565 = vst [vmem:[%s1242_s29 + $0x48] sm:$0xff] %v545_v24 }
  0xbb   : > { %566 = vst [vmem:[%s1242_s29 + $0x50] sm:$0xff] %v546_v28  ;;  %567 = vst [vmem:[%s1242_s29 + $0x58] sm:$0xff] %v547_v29  ;;  %v534_v32 = vpop.permute.xlu1 %533  ;;  %v529_v33 = vpop.permute.xlu0 %528 }
  0xbc   : > { %560 = vst [vmem:[%s1242_s29 + $0x20] sm:$0xff] %v540_v36  ;;  %561 = vst [vmem:[%s1242_s29 + $0x28] sm:$0xff] %v541_v37  ;;  %v552_v40 = vadd.f32 %v534_v32, %v502_v46  ;;  %v553_v62 = vadd.f32 %v534_v32, %v503_v47  ;;  %v554_v4 = vadd.f32 %v534_v32, %v504_v51 }
  0xbd   : > { %562 = vst [vmem:[%s1242_s29 + $0x30] sm:$0xff] %v542_v41  ;;  %563 = vst [vmem:[%s1242_s29 + $0x38] sm:$0xff] %v543_v42  ;;  %v555_v5 = vadd.f32 %v534_v32, %v505_v52  ;;  %v548_v45 = vadd.f32 %v529_v33, %v498_v34  ;;  %v549_v48 = vadd.f32 %v529_v33, %v499_v35  ;;  %582 = sbr.rel (!%p932_p6) target bundleno = 204 (0xcc), region = 59  ;;  %v600_v7 = vld [vmem:[%s1242_s29] sm:$0xff] (%p932_p6)  ;;  %v602_v8 = vld [vmem:[%s1242_s29 + $0x8] sm:$0xff] (%p932_p6) }
  0xbe   : > { %v550_v49 = vadd.f32 %v529_v33, %v500_v38  ;;  %v551_v6 = vadd.f32 %v529_v33, %v501_v39  ;;  %572 = vst [vmem:[%s1242_s29 + $0x80] sm:$0xf] %v552_v40  ;;  %573 = vst [vmem:[%s1242_s29 + $0x88] sm:$0xf] %v553_v62  ;;  %v604_v50 = vld [vmem:[%s1242_s29 + $0x10] sm:$0xff] (%p932_p6)  ;;  %v606_v53 = vld [vmem:[%s1242_s29 + $0x18] sm:$0xff] (%p932_p6) }
  0xbf   : > { %574 = vst [vmem:[%s1242_s29 + $0x90] sm:$0xf] %v554_v4  ;;  %575 = vst [vmem:[%s1242_s29 + $0x98] sm:$0xf] %v555_v5 }
  0xc0   : > { %568 = vst [vmem:[%s1242_s29 + $0x60] sm:$0xff] %v548_v45  ;;  %569 = vst [vmem:[%s1242_s29 + $0x68] sm:$0xff] %v549_v48 }
  0xc1   : > { %570 = vst [vmem:[%s1242_s29 + $0x70] sm:$0xff] %v550_v49  ;;  %571 = vst [vmem:[%s1242_s29 + $0x78] sm:$0xff] %v551_v6  ;;  %v616_v56 = vld [vmem:[%s1242_s29 + $0x40] sm:$0xff] (%p932_p6)  ;;  %v618_v57 = vld [vmem:[%s1242_s29 + $0x48] sm:$0xff] (%p932_p6) }
  0xc2   : > { %v620_v58 = vld [vmem:[%s1242_s29 + $0x50] sm:$0xff]  ;;  %v622_v13 = vld [vmem:[%s1242_s29 + $0x58] sm:$0xff]  ;;  %601 = vst [vmem:[%s587_s15] sm:$0xff] %v600_v7  ;;  %603 = vst [vmem:[%s587_s15 + $0x8] sm:$0xff] %v602_v8 }
  0xc3   : > { %v608_v10 = vld [vmem:[%s1242_s29 + $0x20] sm:$0xff]  ;;  %v610_v11 = vld [vmem:[%s1242_s29 + $0x28] sm:$0xff]  ;;  %605 = vst [vmem:[%s587_s15 + $0x10] sm:$0xff] %v604_v50  ;;  %607 = vst [vmem:[%s587_s15 + $0x18] sm:$0xff] %v606_v53 }
  0xc4   : > { %v612_v12 = vld [vmem:[%s1242_s29 + $0x30] sm:$0xff]  ;;  %v614_v55 = vld [vmem:[%s1242_s29 + $0x38] sm:$0xff]  ;;  %609 = vst [vmem:[%s587_s15 + $0x40] sm:$0xff] %v608_v10  ;;  %611 = vst [vmem:[%s587_s15 + $0x48] sm:$0xff] %v610_v11 }
  0xc5   : > { %613 = vst [vmem:[%s587_s15 + $0x50] sm:$0xff] %v612_v12  ;;  %615 = vst [vmem:[%s587_s15 + $0x58] sm:$0xff] %v614_v55  ;;  %v632_v54 = vld [vmem:[%s1242_s29 + $0x80] sm:$0xff]  ;;  %v634_v59 = vld [vmem:[%s1242_s29 + $0x88] sm:$0xff] }
  0xc6   : > { %617 = vst [vmem:[%s587_s15 + $0x80] sm:$0xff] %v616_v56  ;;  %619 = vst [vmem:[%s587_s15 + $0x88] sm:$0xff] %v618_v57  ;;  %v636_v3 = vld [vmem:[%s1242_s29 + $0x90] sm:$0xff]  ;;  %v638_v30 = vld [vmem:[%s1242_s29 + $0x98] sm:$0xff] }
  0xc7   : > { %v624_v14 = vld [vmem:[%s1242_s29 + $0x60] sm:$0xff]  ;;  %v626_v15 = vld [vmem:[%s1242_s29 + $0x68] sm:$0xff]  ;;  %621 = vst [vmem:[%s587_s15 + $0x90] sm:$0xff] %v620_v58  ;;  %623 = vst [vmem:[%s587_s15 + $0x98] sm:$0xff] %v622_v13 }
  0xc8   : > { %v628_v26 = vld [vmem:[%s1242_s29 + $0x70] sm:$0xff]  ;;  %625 = vst [vmem:[%s587_s15 + $0xc0] sm:$0xff] %v624_v14  ;;  %627 = vst [vmem:[%s587_s15 + $0xc8] sm:$0xff] %v626_v15  ;;  %v630_v27 = vld [vmem:[%s1242_s29 + $0x78] sm:$0xff] }
  0xc9   : > { %629 = vst [vmem:[%s587_s15 + $0xd0] sm:$0xff] %v628_v26  ;;  %631 = vst [vmem:[%s587_s15 + $0xd8] sm:$0xff] %v630_v27 }
  0xca   : > { %633 = vst [vmem:[%s587_s15 + $0x100] sm:$0xff] %v632_v54  ;;  %635 = vst [vmem:[%s587_s15 + $0x108] sm:$0xff] %v634_v59 }
  0xcb   : > { %637 = vst [vmem:[%s587_s15 + $0x110] sm:$0xff] %v636_v3  ;;  %639 = vst [vmem:[%s587_s15 + $0x118] sm:$0xff] %v638_v30 }
  0xcc PF: > { %s13_s18 = sadd.s32 1, %s861_s18   ;;  %s1321_s12 = smov %s841_s13 }
  0xcd   : > { %p10_p12 = scmp.ge.s32.totalorder %s13_s18, 6   ;;  %s1322_s13 = smov %s940_s27 }
  0xce   : > { %s1323_s14 = smov %s853_s16  ;;  %s1324_s15 = smov %s857_s17 }
  0xcf   : > { %s1325_s16 = smov %s1328_s19  ;;  %s1326_s17 = smov %s1332_s20 }
  0xd0   :  { %12 = sbr.rel (!%p10_p12) target bundleno = 4 (0x4), region = 113 }

</bundles_post_ra>
